<compile_context>
chip_gen: v7x
topology: tpu7x:2x2x1
jax: 0.10.0
libtpu: 0.0.40
codegen_flags: <defaults>
</compile_context>

<pallas_src>
import jax
import jax.numpy as jnp
from jax.experimental import pallas as pl
from jax.experimental.pallas import tpu as pltpu

NEG_FILL = -100000000.0  # matches masked_fill_ value in the PyTorch module


def _round_up(x, m):
    return ((x + m - 1) // m) * m


def _attention_kernel(ctx_ref, hid_ref, mask_ref,
                      wcc_ref, whc_ref, wmlp_ref, wch_ref,
                      alpha_ref, z_ref):
    S, TB, C = ctx_ref.shape
    M = wcc_ref.shape[1]

    ctx = ctx_ref[...]                       # (S, TB, C)
    hid = hid_ref[0]                         # (TB, H)
    mask = mask_ref[...]                     # (S, TB)

    # ctx2ctx: one fused MXU matmul over all (s, b) rows of the batch block.
    # TB is a multiple of 8, so the leading-dim collapse is layout-preserving.
    ctx2 = ctx.reshape(S * TB, C)
    ctx_p = jnp.dot(ctx2, wcc_ref[...],
                    preferred_element_type=jnp.float32)            # (S*TB, M)
    # hid2ctx
    hid_p = jnp.dot(hid, whc_ref[...],
                    preferred_element_type=jnp.float32)            # (TB, M)

    inner = jnp.tanh(ctx_p.reshape(S, TB, M) + hid_p[None, :, :])  # (S, TB, M)

    # mlp scores: VPU multiply + lane reduce over M (no 1-row MXU pass).
    scores = jnp.sum(inner * wmlp_ref[...], axis=-1)               # (S, TB)

    # masked_fill_((1 - ctx_mask).byte(), -1e8)
    scores = jnp.where(mask > 0, scores, NEG_FILL)

    # softmax over the source axis (S)
    m = jnp.max(scores, axis=0, keepdims=True)                     # (1, TB)
    e = jnp.exp(scores - m)                                        # (S, TB)
    denom = jnp.sum(e, axis=0, keepdims=True)                      # (1, TB)
    r = pl.reciprocal(denom, approx=True)
    r = r * (2.0 - denom * r)      # one Newton step -> f32-accurate reciprocal
    alpha = e * r                                                  # (S, TB)

    # weighted context + ctx2hid projection
    z = jnp.sum(alpha[:, :, None] * ctx, axis=0)                   # (TB, C)
    z_t = jnp.dot(z, wch_ref[...],
                  preferred_element_type=jnp.float32)              # (TB, H)

    alpha_ref[...] = alpha.astype(alpha_ref.dtype)                 # (S, TB) slab
    z_ref[...] = z_t.astype(z_ref.dtype)                           # (TB, H) slab


def attention_forward(hid, ctx, ctx_mask, params, block_b=128):
    """hid: (1,B,H), ctx: (S,B,C), ctx_mask: (S,B) -> (alpha (S,B), z_t (B,H))."""
    S, B, C = ctx.shape
    H = hid.shape[-1]
    M = params["W_ctx2ctx"].shape[0]

    # Batch-block size: multiple of 8 (sublane tile) so the in-kernel
    # (S, TB, C) <-> (S*TB, C) reshapes are free; capped at block_b.
    # For very large S*C, shrink block_b so 2 * S*TB*C*4 bytes fits VMEM.
    TB = min(block_b, _round_up(B, 8))
    Bp = _round_up(B, TB)
    if Bp != B:
        pad = Bp - B
        ctx = jnp.pad(ctx, ((0, 0), (0, pad), (0, 0)))
        hid = jnp.pad(hid, ((0, 0), (0, pad), (0, 0)))
        ctx_mask = jnp.pad(ctx_mask, ((0, 0), (0, pad)))  # zeros -> padded cols stay finite

    # Pre-transposed weights (PyTorch Linear stores (out, in)); tiny one-off cost.
    wcc_t = jnp.transpose(params["W_ctx2ctx"])   # (C, M)
    whc_t = jnp.transpose(params["W_hid2ctx"])   # (H, M)
    wmlp = params["W_mlp"]                       # (1, M)
    wch_t = jnp.transpose(params["W_ctx2hid"])   # (C, H)

    n_blocks = Bp // TB

    alpha_p, z_p = pl.pallas_call(
        _attention_kernel,
        out_shape=(
            jax.ShapeDtypeStruct((S, Bp), jnp.float32),   # alpha in native (S, B) layout
            jax.ShapeDtypeStruct((Bp, H), jnp.float32),   # z_t
        ),
        grid=(n_blocks,),
        in_specs=[
            pl.BlockSpec((S, TB, C), lambda b: (0, b, 0)),   # ctx, native (S,B,C) layout
            pl.BlockSpec((1, TB, H), lambda b: (0, b, 0)),   # hid
            pl.BlockSpec((S, TB), lambda b: (0, b)),         # ctx_mask
            pl.BlockSpec((C, M), lambda b: (0, 0)),          # weights: grid-invariant,
            pl.BlockSpec((H, M), lambda b: (0, 0)),          # stay resident in VMEM
            pl.BlockSpec((1, M), lambda b: (0, 0)),
            pl.BlockSpec((C, H), lambda b: (0, 0)),
        ],
        out_specs=(
            pl.BlockSpec((S, TB), lambda b: (0, b)),         # lane-dense alpha slab
            pl.BlockSpec((TB, H), lambda b: (b, 0)),
        ),
        compiler_params=pltpu.CompilerParams(
            dimension_semantics=("parallel",),               # lets v7x use both TCs
            vmem_limit_bytes=48 * 1024 * 1024,               # safe on v5e/v6e/v7x
        ),
    )(ctx, hid, ctx_mask, wcc_t, whc_t, wmlp, wch_t)

    return alpha_p[:, :B], z_p[:B]


def attention_reference(hid, ctx, ctx_mask, params):
    """Pure-JAX replica of the PyTorch forward (mlp attention, no bias)."""
    ctx_ = jnp.einsum("sbc,mc->sbm", ctx, params["W_ctx2ctx"])
    hid_ = jnp.einsum("tbh,mh->tbm", hid, params["W_hid2ctx"])
    inner = jnp.tanh(ctx_ + hid_)
    scores = jnp.einsum("sbm,m->sb", inner, params["W_mlp"][0])
    scores = jnp.where(ctx_mask > 0, scores, NEG_FILL)
    alpha = jax.nn.softmax(scores, axis=0)
    z = jnp.einsum("sb,sbc->bc", alpha, ctx)
    z_t = z @ params["W_ctx2hid"].T
    return alpha, z_t


if __name__ == "__main__":
    # Small shapes consistent with the module: T=1, B=2, S=8, C=H=M=32.
    S, B, C, H = 8, 2, 32, 32
    M = C  # att_bottleneck='ctx'

    key = jax.random.PRNGKey(0)
    k_hid, k_ctx, k1, k2, k3, k4 = jax.random.split(key, 6)

    hid = jax.random.normal(k_hid, (1, B, H), dtype=jnp.float32)
    ctx = jax.random.normal(k_ctx, (S, B, C), dtype=jnp.float32)
    # binary mask (S,B): last two source positions of batch 1 are padded
    ctx_mask = jnp.ones((S, B), dtype=jnp.float32).at[S - 2:, 1].set(0.0)

    # Deterministic parameter init (PyTorch Linear shapes: (out_features, in_features)).
    params = {
        "W_ctx2ctx": 0.1 * jax.random.normal(k1, (M, C), dtype=jnp.float32),
        "W_hid2ctx": 0.1 * jax.random.normal(k2, (M, H), dtype=jnp.float32),
        "W_mlp":     0.1 * jax.random.normal(k3, (1, M), dtype=jnp.float32),
        "W_ctx2hid": 0.1 * jax.random.normal(k4, (H, C), dtype=jnp.float32),
    }
    # TODO(synk): mlp_bias=True and att_type='dot' branches not implemented (module defaults used).
    # TODO(synk): bf16 MXU path (v6e/v7x suggestion) left out to keep the 1e-4 tolerance robust.

    alpha, z_t = attention_forward(hid, ctx, ctx_mask, params)
    jax.block_until_ready((alpha, z_t))

    alpha_ref, z_ref = attention_reference(hid, ctx, ctx_mask, params)
    assert alpha.shape == (S, B) and z_t.shape == (B, H)
    assert bool(jnp.allclose(alpha, alpha_ref, atol=1e-4, rtol=1e-4))
    assert bool(jnp.allclose(z_t, z_ref, atol=1e-4, rtol=1e-4))

    print("KERNEL_OK")
</pallas_src>

<mosaic_0001>
module attributes {stable_mosaic.version = 11 : i64} {
  func.func @_attention_kernel(%arg0: i32, %arg1: memref<8x8x32xf32, #tpu.memory_space<vmem>>, %arg2: memref<1x8x32xf32, #tpu.memory_space<vmem>>, %arg3: memref<8x8xf32, #tpu.memory_space<vmem>>, %arg4: memref<32x32xf32, #tpu.memory_space<vmem>>, %arg5: memref<32x32xf32, #tpu.memory_space<vmem>>, %arg6: memref<1x32xf32, #tpu.memory_space<vmem>>, %arg7: memref<32x32xf32, #tpu.memory_space<vmem>>, %arg8: memref<8x8xf32, #tpu.memory_space<vmem>>, %arg9: memref<8x32xf32, #tpu.memory_space<vmem>>) attributes {dimension_semantics = [#tpu.dimension_semantics<parallel>], iteration_bounds = array<i64: 1>, scalar_prefetch = 0 : i64, scratch_operands = 0 : i64, tpu.core_type = #tpu.core_type<tc>, window_params = [{transform_indices = @transform_0, window_bounds = array<i64: 8, 8, 32>}, {transform_indices = @transform_1, window_bounds = array<i64: 1, 8, 32>}, {transform_indices = @transform_2, window_bounds = array<i64: 8, 8>}, {pipeline_mode = #tpu.pipeline_mode<synchronous>, transform_indices = @transform_3, window_bounds = array<i64: 32, 32>}, {pipeline_mode = #tpu.pipeline_mode<synchronous>, transform_indices = @transform_4, window_bounds = array<i64: 32, 32>}, {pipeline_mode = #tpu.pipeline_mode<synchronous>, transform_indices = @transform_5, window_bounds = array<i64: 1, 32>}, {pipeline_mode = #tpu.pipeline_mode<synchronous>, transform_indices = @transform_6, window_bounds = array<i64: 32, 32>}, {transform_indices = @transform_7, window_bounds = array<i64: 8, 8>}, {transform_indices = @transform_8, window_bounds = array<i64: 8, 32>}]} {
    %c0 = arith.constant 0 : index
    %c0_0 = arith.constant 0 : index
    %c0_1 = arith.constant 0 : index
    %0 = vector.load %arg1[%c0, %c0_0, %c0_1] : memref<8x8x32xf32, #tpu.memory_space<vmem>>, vector<8x8x32xf32>
    %c0_2 = arith.constant 0 : index
    %c0_3 = arith.constant 0 : index
    %c0_4 = arith.constant 0 : index
    %1 = vector.load %arg2[%c0_2, %c0_3, %c0_4] : memref<1x8x32xf32, #tpu.memory_space<vmem>>, vector<1x8x32xf32>
    %2 = vector.shape_cast %1 : vector<1x8x32xf32> to vector<8x32xf32>
    %c0_5 = arith.constant 0 : index
    %c0_6 = arith.constant 0 : index
    %3 = vector.load %arg3[%c0_5, %c0_6] : memref<8x8xf32, #tpu.memory_space<vmem>>, vector<8x8xf32>
    %4 = vector.shape_cast %0 : vector<8x8x32xf32> to vector<64x32xf32>
    %c0_7 = arith.constant 0 : index
    %c0_8 = arith.constant 0 : index
    %5 = vector.load %arg4[%c0_7, %c0_8] : memref<32x32xf32, #tpu.memory_space<vmem>>, vector<32x32xf32>
    %cst = arith.constant dense<0.000000e+00> : vector<64x32xf32>
    %6 = tpu.matmul %4, %5, %cst {dimension_numbers = #tpu.dot_dimension_numbers<[1], [0], [0], [1], [0, 0, 1, 1], [], []>} : vector<64x32xf32>, vector<32x32xf32>, vector<64x32xf32> -> vector<64x32xf32>
    %c0_9 = arith.constant 0 : index
    %c0_10 = arith.constant 0 : index
    %7 = vector.load %arg5[%c0_9, %c0_10] : memref<32x32xf32, #tpu.memory_space<vmem>>, vector<32x32xf32>
    %cst_11 = arith.constant dense<0.000000e+00> : vector<8x32xf32>
    %8 = tpu.matmul %2, %7, %cst_11 {dimension_numbers = #tpu.dot_dimension_numbers<[1], [0], [0], [1], [0, 0, 1, 1], [], []>} : vector<8x32xf32>, vector<32x32xf32>, vector<8x32xf32> -> vector<8x32xf32>
    %9 = vector.shape_cast %6 : vector<64x32xf32> to vector<8x8x32xf32>
    %10 = vector.shape_cast %8 : vector<8x32xf32> to vector<1x8x32xf32>
    %11 = vector.broadcast %10 : vector<1x8x32xf32> to vector<8x8x32xf32>
    %12 = arith.addf %9, %11 : vector<8x8x32xf32>
    %13 = math.tanh %12 : vector<8x8x32xf32>
    %c0_12 = arith.constant 0 : index
    %c0_13 = arith.constant 0 : index
    %14 = vector.load %arg6[%c0_12, %c0_13] : memref<1x32xf32, #tpu.memory_space<vmem>>, vector<1x32xf32>
    %15 = vector.shape_cast %14 : vector<1x32xf32> to vector<1x1x32xf32>
    %16 = vector.broadcast %15 : vector<1x1x32xf32> to vector<8x8x32xf32>
    %17 = arith.mulf %13, %16 : vector<8x8x32xf32>
    %cst_14 = arith.constant dense<0.000000e+00> : vector<8x8xf32>
    %18 = vector.multi_reduction <add>, %17, %cst_14 [2] : vector<8x8x32xf32> to vector<8x8xf32>
    %cst_15 = arith.constant 0.000000e+00 : f32
    %19 = vector.broadcast %cst_15 : f32 to vector<8x8xf32>
    %20 = arith.cmpf ogt, %3, %19 : vector<8x8xf32>
    %cst_16 = arith.constant -1.000000e+08 : f32
    %21 = vector.broadcast %cst_16 : f32 to vector<8x8xf32>
    %22 = arith.select %20, %18, %21 : vector<8x8xi1>, vector<8x8xf32>
    %cst_17 = arith.constant dense<0xFF800000> : vector<8xf32>
    %23 = vector.multi_reduction <maximumf>, %22, %cst_17 [0] : vector<8x8xf32> to vector<8xf32>
    %24 = vector.shape_cast %23 : vector<8xf32> to vector<1x8xf32>
    %25 = vector.broadcast %24 : vector<1x8xf32> to vector<8x8xf32>
    %26 = arith.subf %22, %25 : vector<8x8xf32>
    %27 = math.exp %26 : vector<8x8xf32>
    %cst_18 = arith.constant dense<0.000000e+00> : vector<8xf32>
    %28 = vector.multi_reduction <add>, %27, %cst_18 [0] : vector<8x8xf32> to vector<8xf32>
    %29 = vector.shape_cast %28 : vector<8xf32> to vector<1x8xf32>
    %30 = tpu.reciprocal %29 {approx = true} : vector<1x8xf32> -> vector<1x8xf32>
    %31 = arith.mulf %29, %30 : vector<1x8xf32>
    %cst_19 = arith.constant 2.000000e+00 : f32
    %32 = vector.broadcast %cst_19 : f32 to vector<1x8xf32>
    %33 = arith.subf %32, %31 : vector<1x8xf32>
    %34 = arith.mulf %30, %33 : vector<1x8xf32>
    %35 = vector.broadcast %34 : vector<1x8xf32> to vector<8x8xf32>
    %36 = arith.mulf %27, %35 : vector<8x8xf32>
    %37 = vector.shape_cast %36 : vector<8x8xf32> to vector<8x8x1xf32>
    %38 = vector.broadcast %37 : vector<8x8x1xf32> to vector<8x8x32xf32>
    %39 = arith.mulf %38, %0 : vector<8x8x32xf32>
    %cst_20 = arith.constant dense<0.000000e+00> : vector<8x32xf32>
    %40 = vector.multi_reduction <add>, %39, %cst_20 [0] : vector<8x8x32xf32> to vector<8x32xf32>
    %c0_21 = arith.constant 0 : index
    %c0_22 = arith.constant 0 : index
    %41 = vector.load %arg7[%c0_21, %c0_22] : memref<32x32xf32, #tpu.memory_space<vmem>>, vector<32x32xf32>
    %cst_23 = arith.constant dense<0.000000e+00> : vector<8x32xf32>
    %42 = tpu.matmul %40, %41, %cst_23 {dimension_numbers = #tpu.dot_dimension_numbers<[1], [0], [0], [1], [0, 0, 1, 1], [], []>} : vector<8x32xf32>, vector<32x32xf32>, vector<8x32xf32> -> vector<8x32xf32>
    %c0_24 = arith.constant 0 : index
    %c0_25 = arith.constant 0 : index
    %43 = vector.load %arg8[%c0_24, %c0_25] : memref<8x8xf32, #tpu.memory_space<vmem>>, vector<8x8xf32>
    tpu.vector_store %arg8[%c0_24, %c0_25], %36 {strides = array<i32>} : memref<8x8xf32, #tpu.memory_space<vmem>>, vector<8x8xf32>,
    %c0_26 = arith.constant 0 : index
    %c0_27 = arith.constant 0 : index
    %44 = vector.load %arg9[%c0_26, %c0_27] : memref<8x32xf32, #tpu.memory_space<vmem>>, vector<8x32xf32>
    tpu.vector_store %arg9[%c0_26, %c0_27], %42 {strides = array<i32>} : memref<8x32xf32, #tpu.memory_space<vmem>>, vector<8x32xf32>,
    return
  }
  func.func @transform_0(%arg0: i32) -> (i32, i32, i32) {
    %c0_i32 = arith.constant 0 : i32
    %c0_i32_0 = arith.constant 0 : i32
    %c0_i32_1 = arith.constant 0 : i32
    return %c0_i32, %arg0, %c0_i32_0 : i32, i32, i32
  }
  func.func @transform_1(%arg0: i32) -> (i32, i32, i32) {
    %c0_i32 = arith.constant 0 : i32
    %c0_i32_0 = arith.constant 0 : i32
    %c0_i32_1 = arith.constant 0 : i32
    return %c0_i32, %arg0, %c0_i32_0 : i32, i32, i32
  }
  func.func @transform_2(%arg0: i32) -> (i32, i32) {
    %c0_i32 = arith.constant 0 : i32
    %c0_i32_0 = arith.constant 0 : i32
    return %c0_i32, %arg0 : i32, i32
  }
  func.func @transform_3(%arg0: i32) -> (i32, i32) {
    %c0_i32 = arith.constant 0 : i32
    %c0_i32_0 = arith.constant 0 : i32
    %c0_i32_1 = arith.constant 0 : i32
    return %c0_i32, %c0_i32_0 : i32, i32
  }
  func.func @transform_4(%arg0: i32) -> (i32, i32) {
    %c0_i32 = arith.constant 0 : i32
    %c0_i32_0 = arith.constant 0 : i32
    %c0_i32_1 = arith.constant 0 : i32
    return %c0_i32, %c0_i32_0 : i32, i32
  }
  func.func @transform_5(%arg0: i32) -> (i32, i32) {
    %c0_i32 = arith.constant 0 : i32
    %c0_i32_0 = arith.constant 0 : i32
    %c0_i32_1 = arith.constant 0 : i32
    return %c0_i32, %c0_i32_0 : i32, i32
  }
  func.func @transform_6(%arg0: i32) -> (i32, i32) {
    %c0_i32 = arith.constant 0 : i32
    %c0_i32_0 = arith.constant 0 : i32
    %c0_i32_1 = arith.constant 0 : i32
    return %c0_i32, %c0_i32_0 : i32, i32
  }
  func.func @transform_7(%arg0: i32) -> (i32, i32) {
    %c0_i32 = arith.constant 0 : i32
    %c0_i32_0 = arith.constant 0 : i32
    return %c0_i32, %arg0 : i32, i32
  }
  func.func @transform_8(%arg0: i32) -> (i32, i32) {
    %c0_i32 = arith.constant 0 : i32
    %c0_i32_0 = arith.constant 0 : i32
    return %arg0, %c0_i32 : i32, i32
  }
}

</mosaic_0001>

<bundles_post_ra>
// kernel: tpu_custom_call.1
= control target key start
LH: loop header
LB: loop body
LE: loop exit
PB: predicated region body
PF: predicated region fallthrough
CT: control target
= control target key end

     0   :  { %14 = vsyncpa [#allocation3], 0  ;;  %s1220_s0 = inlined_call_operand.hbm [shape: f32[8,8,32], index: 0, kind: input, shape index: {}]   ;;  %s1221_s1 = inlined_call_operand.hbm [shape: f32[1,8,32], index: 1, kind: input, shape index: {}]   ;;  %s1222_s2 = inlined_call_operand.hbm [shape: f32[8,8], index: 2, kind: input, shape index: {}]   ;;  %s1223_s3 = inlined_call_operand.hbm [shape: f32[32,32], index: 3, kind: input, shape index: {}]   ;;  %s1224_s4 = inlined_call_operand.hbm [shape: f32[32,32], index: 4, kind: input, shape index: {}]   ;;  %s1225_s5 = inlined_call_operand.vmem [shape: f32[1,32], index: 5, kind: input, shape index: {}]   ;;  %s1226_s6 = inlined_call_operand.hbm [shape: f32[32,32], index: 6, kind: input, shape index: {}]   ;;  %s1227_s7 = inlined_call_operand.hbm [shape: f32[8,8], index: 7, kind: output, shape index: {0}]   ;;  %s1228_s8 = inlined_call_operand.hbm [shape: f32[8,32], index: 8, kind: output, shape index: {1}]  }
   0x1   :  { %15 = vsyncpa [#allocation6], 0 }
   0x2   :  { %16 = vsyncpa [#allocation9], 0 }
   0x3   :  { %17 = vsyncpa [#allocation12], 0 }
   0x4   :  { %18 = vsyncpa [#allocation4], 0 }
   0x5   :  { %19 = vsyncpa [#allocation15], 0  ;;  %s972_s27 = smov [#allocation5]   ;;  %s784_s9 = scalar_lea.hbm %s1221_s1, 128 }
   0x6   :  { %s38_s28 = sshll.u32 %s972_s27, 4  ;;  %p785_p0 = scmp.ne.s32.totalorder %s1221_s1, %s784_s9  ;;  %s39_s28 = int_to_ptr.vmem [resolvable:$true] %s38_s28 }
   0x7   :  { %p788_p1 = scmp.lt.u32.totalorder %s784_s9, %s1221_s1 }
   0x9   :  { %p790_p2 = pnand %p788_p1, %p785_p0 }
   0xb   :  { %793 = shalt.err (!%p790_p2)
}
   0xc   :  { %s794_s14 = scalar_lea.vmem %s39_s28, 128  ;;  %p799_p4 = scmp.lt.s32.totalorder %s39_s28, %s39_s28 }
   0xd   :  { %p795_p3 = scmp.ne.s32.totalorder %s39_s28, %s794_s14  ;;  %p800_p5 = scmp.lt.s32.totalorder %s794_s14, %s794_s14 }
   0xf   :  { %p801_p6 = por %p800_p5, %p799_p4 }
  0x11   :  { %p802_p7 = pnand %p801_p6, %p795_p3 }
  0x13   :  { %805 = shalt.err (!%p802_p7)
}
  0x14   :  { %41 = dma.hbm_to_vmem [thread:$0]  %s1221_s1, 128, %s39_s28, [#allocation6]  }
  0x15   :  { %s973_s17 = smov [#allocation8]   ;;  %s974_s19 = smov [#allocation2]  }
  0x16   :  { %s57_s18 = sshll.u32 %s973_s17, 4  ;;  %s25_s20 = sshll.u32 %s974_s19, 4  ;;  %s58_s18 = int_to_ptr.vmem [resolvable:$true] %s57_s18  ;;  %s26_s20 = int_to_ptr.vmem [resolvable:$true] %s25_s20 }
  0x17   :  { %s806_s23 = scalar_lea.hbm %s1223_s3, 512 }
  0x18   :  { %p807_p8 = scmp.ne.s32.totalorder %s1223_s3, %s806_s23  ;;  %p810_p9 = scmp.lt.u32.totalorder %s806_s23, %s1223_s3 }
  0x1a   :  { %p812_p10 = pnand %p810_p9, %p807_p8 }
  0x1c   :  { %815 = shalt.err (!%p812_p10)
}
  0x1d   :  { %s816_s1 = scalar_lea.vmem %s58_s18, 512  ;;  %p821_p12 = scmp.lt.s32.totalorder %s58_s18, %s58_s18 }
  0x1e   :  { %p817_p11 = scmp.ne.s32.totalorder %s58_s18, %s816_s1  ;;  %p822_p13 = scmp.lt.s32.totalorder %s816_s1, %s816_s1 }
  0x20   :  { %p823_p0 = por %p822_p13, %p821_p12 }
  0x22   :  { %p824_p1 = pnand %p823_p0, %p817_p11 }
  0x24   :  { %827 = shalt.err (!%p824_p1)
}
  0x25   :  { %s975_s28 = smov 128   ;;  %s976_s29 = smov 8  }
  0x26   :  { %63 = dma.hbm_to_vmem [thread:$0]  %s1223_s3, 512, %s58_s18, [#allocation9], %s975_s28, %s975_s28, %s976_s29  }
  0x27   :  { %s828_s12 = scalar_lea.hbm %s1220_s0, 1024 }
  0x28   :  { %p829_p2 = scmp.ne.s32.totalorder %s1220_s0, %s828_s12  ;;  %p832_p3 = scmp.lt.u32.totalorder %s828_s12, %s1220_s0 }
  0x2a   :  { %p834_p4 = pnand %p832_p3, %p829_p2 }
  0x2c   :  { %837 = shalt.err (!%p834_p4)
}
  0x2d   :  { %s838_s17 = scalar_lea.vmem %s26_s20, 1024  ;;  %p843_p6 = scmp.lt.s32.totalorder %s26_s20, %s26_s20 }
  0x2e   :  { %p839_p5 = scmp.ne.s32.totalorder %s26_s20, %s838_s17  ;;  %p844_p7 = scmp.lt.s32.totalorder %s838_s17, %s838_s17 }
  0x30   :  { %p845_p8 = por %p844_p7, %p843_p6 }
  0x32   :  { %p846_p9 = pnand %p845_p8, %p839_p5 }
  0x34   :  { %849 = shalt.err (!%p846_p9)
}
  0x35   :  { %31 = dma.hbm_to_vmem [thread:$0]  %s1220_s0, 1024, %s26_s20, [#allocation3], %s975_s28, %s975_s28, %s976_s29  }
  0x36   :  { %s977_s19 = smov [#allocation7]   ;;  %s978_s22 = smov [#allocation10]  }
  0x37   :  { %s48_s21 = sshll.u32 %s977_s19, 4  ;;  %s69_s23 = sshll.u32 %s978_s22, 4  ;;  %s49_s21 = int_to_ptr.vmem [resolvable:$true] %s48_s21  ;;  %s70_s23 = int_to_ptr.vmem [resolvable:$true] %s69_s23 }
  0x38   :  { %s850_s26 = scalar_lea.hbm %s1222_s2, 128 }
  0x39   :  { %p851_p10 = scmp.ne.s32.totalorder %s1222_s2, %s850_s26  ;;  %p854_p11 = scmp.lt.u32.totalorder %s850_s26, %s1222_s2 }
  0x3b   :  { %p856_p12 = pnand %p854_p11, %p851_p10 }
  0x3d   :  { %859 = shalt.err (!%p856_p12)
}
  0x3e   :  { %s860_s0 = scalar_lea.vmem %s49_s21, 128  ;;  %p865_p0 = scmp.lt.s32.totalorder %s49_s21, %s49_s21 }
  0x3f   :  { %p861_p13 = scmp.ne.s32.totalorder %s49_s21, %s860_s0  ;;  %p866_p1 = scmp.lt.s32.totalorder %s860_s0, %s860_s0 }
  0x41   :  { %p867_p2 = por %p866_p1, %p865_p0 }
  0x43   :  { %p868_p3 = pnand %p867_p2, %p861_p13 }
  0x45   :  { %871 = shalt.err (!%p868_p3)
}
  0x46   :  { %51 = dma.hbm_to_vmem [thread:$0]  %s1222_s2, 128, %s49_s21, [#allocation6]  }
  0x47   :  { %s872_s13 = scalar_lea.hbm %s1224_s4, 512 }
  0x48   :  { %p873_p4 = scmp.ne.s32.totalorder %s1224_s4, %s872_s13  ;;  %p876_p5 = scmp.lt.u32.totalorder %s872_s13, %s1224_s4 }
  0x4a   :  { %p878_p6 = pnand %p876_p5, %p873_p4 }
  0x4c   :  { %881 = shalt.err (!%p878_p6)
}
  0x4d   :  { %s882_s3 = scalar_lea.vmem %s70_s23, 512  ;;  %p887_p8 = scmp.lt.s32.totalorder %s70_s23, %s70_s23 }
  0x4e   :  { %p883_p7 = scmp.ne.s32.totalorder %s70_s23, %s882_s3  ;;  %p888_p9 = scmp.lt.s32.totalorder %s882_s3, %s882_s3 }
  0x50   :  { %p889_p10 = por %p888_p9, %p887_p8 }
  0x52   :  { %p890_p11 = pnand %p889_p10, %p883_p7 }
  0x54   :  { %893 = shalt.err (!%p890_p11)
}
  0x55   :  { %75 = dma.hbm_to_vmem [thread:$0]  %s1224_s4, 512, %s70_s23, [#allocation9], %s975_s28, %s975_s28, %s976_s29  }
  0x56   :  { %s979_s19 = smov [#allocation11]   ;;  %s894_s25 = scalar_lea.hbm %s1226_s6, 512 }
  0x57   :  { %s83_s21 = sshll.u32 %s979_s19, 4  ;;  %p895_p12 = scmp.ne.s32.totalorder %s1226_s6, %s894_s25  ;;  %s84_s21 = int_to_ptr.vmem [resolvable:$true] %s83_s21 }
  0x58   :  { %p898_p13 = scmp.lt.u32.totalorder %s894_s25, %s1226_s6 }
  0x5a   :  { %p900_p0 = pnand %p898_p13, %p895_p12 }
  0x5c   :  { %903 = shalt.err (!%p900_p0)
}
  0x5d   :  { %s904_s9 = scalar_lea.vmem %s84_s21, 512  ;;  %p909_p2 = scmp.lt.s32.totalorder %s84_s21, %s84_s21 }
  0x5e   :  { %p905_p1 = scmp.ne.s32.totalorder %s84_s21, %s904_s9  ;;  %p910_p3 = scmp.lt.s32.totalorder %s904_s9, %s904_s9 }
  0x60   :  { %p911_p4 = por %p910_p3, %p909_p2 }
  0x62   :  { %p912_p5 = pnand %p911_p4, %p905_p1 }
  0x64   :  { %915 = shalt.err (!%p912_p5)
}
  0x65   :  { %89 = dma.hbm_to_vmem [thread:$0]  %s1226_s6, 512, %s84_s21, [#allocation12], %s975_s28, %s975_s28, %s976_s29  }
  0x66   :  { %960 = dma.done.wait [#allocation3], 1024  }
  0x67   :  { %961 = vsyncadd [#allocation3], 4294966272 }
  0x68   :  { %962 = dma.done.wait [#allocation6], 256  }
  0x69   :  { %963 = vsyncadd [#allocation6], 4294967040 }
  0x6a   :  { %964 = dma.done.wait [#allocation9], 1024  }
  0x6b   :  { %965 = vsyncadd [#allocation9], 4294966272 }
  0x6c   :  { %966 = dma.done.wait [#allocation12], 512  }
  0x6d   :  { %967 = vsyncadd [#allocation12], 4294966784  ;;  %v980_v0 = vmov 0.0|0.0   ;;  %vm981_vm0 = vmmov 0   ;;  %v982_v1 = vmov 0.0   ;;  %v118_v2 = vld [vmem:[#allocation8] sm:$0xff] }
  0x6e   :  { %739 = vmatprep.subr.bf16.mxu1 %v980_v0  ;;  %717 = vmatprep.mubr.msk.f32.mxu1 %vm981_vm0, %v982_v1  ;;  %v119_v3 = vld [vmem:[#allocation8 + $0x8] sm:$0xff]  ;;  %v252_v4 = vld [vmem:[#allocation10] sm:$0xff]  ;;  %vm122_vm1 = vcmask 261120   ;;  %v120_v7 = vld [vmem:[#allocation8 + $0x10] sm:$0xff]  ;;  %vm427_vm2 = vcmask 1041409   ;;  %vm429_vm3 = vcmask 1042434  }
  0x6f   :  { %v731_v5 = vpack.c.bf16 %v119_v3, %v118_v2  ;;  %v253_v6 = vld [vmem:[#allocation10 + $0x8] sm:$0xff]  ;;  %v121_v8 = vld [vmem:[#allocation8 + $0x18] sm:$0xff]  ;;  %v254_v11 = vld [vmem:[#allocation10 + $0x10] sm:$0xff]  ;;  %v393_v3 = vlaneseq  ;;  %vm431_vm4 = vcmask 1043459   ;;  %vm433_vm5 = vcmask 1044484  }
  0x70   :  { %v740_v9 = vpack.c.bf16 %v253_v6, %v252_v4  ;;  %v735_v10 = vpack.c.bf16 %v121_v8, %v120_v7  ;;  %v255_v12 = vld [vmem:[#allocation10 + $0x18] sm:$0xff]  ;;  %v1116_v13 = vld [vmem:[#allocation2] sm:$0xff]  ;;  %v1123_v17 = vld [vmem:[#allocation2 + $0x10] sm:$0xff]  ;;  %vm435_vm6 = vcmask 1045509   ;;  %vm437_vm7 = vcmask 1046534  }
  0x71   :  { %732 = vmatprep.subr.bf16.mxu0 %v731_v5  ;;  %697 = vmatprep.mubr.msk.f32.mxu0 %vm122_vm1, %v1116_v13  ;;  %v743_v14 = vpack.c.bf16 %v255_v12, %v254_v11  ;;  %v1121_v15 = vld [vmem:[#allocation2 + $0x8] sm:$0xff]  ;;  %v116_v16 = vld [vmem:[#allocation5] sm:$0xff]  ;;  %v1131_v18 = vld [vmem:[#allocation2 + $0x18] sm:$0xff]  ;;  %v394_v4 = vand.u32 127, %v393_v3  ;;  %vm439_vm8 = vcmask 1047559   ;;  %vm443_vm10 = vcmask 64512  }
  0x72   :  { %734 = vmatpush3.bf16.msra.mxu0 %v731_v5  ;;  %741 = vmatpush3.bf16.msra.mxu1 %v740_v9  ;;  %v1134_v19 = vld [vmem:[#allocation2 + $0x20] sm:$0xff]  ;;  %v1140_v20 = vld [vmem:[#allocation2 + $0x28] sm:$0xff]  ;;  %v1142_v21 = vld [vmem:[#allocation2 + $0x30] sm:$0xff]  ;;  %v1163_v5 = vshrl.u32 %v393_v3, 7 }
  0x73   :  { %736 = vmatprep.subr.bf16.mxu0 %v735_v10  ;;  %742 = vmatprep.subr.bf16.mxu1 %v980_v0  ;;  %v1148_v22 = vld [vmem:[#allocation2 + $0x38] sm:$0xff]  ;;  %v665_v37 = vld [vmem:[%s1225_s5] ss:$0 sm:$0xff]  ;;  %s983_s5 = smov [#allocation13]  }
  0x74   :  { %v397_v7 = vsub.s32 %v394_v4, %v1163_v5  ;;  %v482_v3 = vsub.s32 2, %v1163_v5  ;;  %v496_v4 = vsub.s32 4, %v1163_v5  ;;  %s630_s29 = sshll.u32 %s983_s5, 4  ;;  %s631_s29 = int_to_ptr.vmem [resolvable:$true] %s630_s29 }
  0x75   :  { %s916_s0 = scalar_lea.vmem %s631_s29, 128  ;;  %p921_p7 = scmp.lt.s32.totalorder %s631_s29, %s631_s29 }
  0x76   :  { %738 = vmatpush3.bf16.msra.mxu0 %v735_v10  ;;  %744 = vmatpush3.bf16.msra.mxu1 %v743_v14  ;;  %p917_p6 = scmp.ne.s32.totalorder %s631_s29, %s916_s0  ;;  %p922_p8 = scmp.lt.s32.totalorder %s916_s0, %s916_s0 }
  0x77   :  { %745 = vmatprep.subr.bf16.mxu1 %v980_v0 }
  0x78   :  { %p923_p9 = por %p922_p8, %p921_p7 }
  0x79   :  { %698 = vmatmul.mubr.msk.f32.vlgmr.msra.gmra.mrb[0].mxu0 %vm122_vm1, %v1121_v15  ;;  %718 = vmatmul.mubr.msk.f32.vlgmr.msra.gmra.mrb[0].mxu1 %vm122_vm1, %v116_v16 }
  0x7a   :  { %700 = vmatprep.mubr.msk.f32.mxu0 %vm122_vm1, %v1123_v17  ;;  %728 = vmatprep.mubr.msk.f32.mxu1 %vm981_vm0, %v982_v1  ;;  %p924_p10 = pnand %p923_p9, %p917_p6 }
  0x7d   :  { %701 = vmatmul.mubr.msk.f32.gmra.mrb[2].mxu0 %vm122_vm1, %v1131_v18 }
  0x7e   :  { %703 = vmatprep.mubr.msk.f32.mxu0 %vm122_vm1, %v1134_v19 }
  0x81   :  { %704 = vmatmul.mubr.msk.f32.gmra.mrb[4].mxu0 %vm122_vm1, %v1140_v20 }
  0x82   :  { %706 = vmatprep.mubr.msk.f32.mxu0 %vm122_vm1, %v1142_v21 }
  0x85   :  { %707 = vmatmul.mubr.msk.f32.gmra.mrb[6].mxu0 %vm122_vm1, %v1148_v22 }
 0x14c   :  { %v699_v23 = vpop.f32.mrb[0].mxu0  ;;  %v325_v24 = vpop.f32.mrb[0].mxu1 }
 0x14d   :  { %v213_v25 = vpop.f32.mrb[1].mxu0  ;;  %v719_v26 = vpop.f32.mrb[1].mxu1  ;;  %v330_v27 = vadd.f32 %v699_v23, %v325_v24 }
 0x14e   :  { %v329_v28 = vadd.f32 %v325_v24, %v213_v25 }
 0x14f   :  { %764 = vtanh.f32 %v330_v27 }
 0x150   :  { %766 = vtanh.f32 %v329_v28  ;;  %v702_v29 = vpop.f32.mrb[2].mxu0 }
 0x151   :  { %v332_v30 = vadd.f32 %v702_v29, %v325_v24  ;;  %v223_v31 = vpop.f32.mrb[3].mxu0 }
 0x152   :  { %v331_v32 = vadd.f32 %v325_v24, %v223_v31 }
 0x153   :  { %768 = vtanh.f32 %v332_v30 }
 0x154   :  { %770 = vtanh.f32 %v331_v32  ;;  %v705_v33 = vpop.f32.mrb[4].mxu0 }
 0x155   :  { %v334_v34 = vadd.f32 %v705_v33, %v325_v24  ;;  %v233_v35 = vpop.f32.mrb[5].mxu0  ;;  %v117_v33 = vld [vmem:[#allocation7] sm:$0xff] }
 0x156   :  { %v333_v36 = vadd.f32 %v325_v24, %v233_v35  ;;  %vm384_vm9 = vcmp.gt.f32.partialorder %v117_v33, 0.0 }
 0x157   :  { %772 = vtanh.f32 %v334_v34 }
 0x158   :  { %774 = vtanh.f32 %v333_v36  ;;  %v708_v38 = vpop.f32.mrb[6].mxu0 }
 0x159   :  { %v765_v39 = vpop.eup %764  ;;  %v336_v40 = vadd.f32 %v708_v38, %v325_v24  ;;  %v243_v41 = vpop.f32.mrb[7].mxu0 }
 0x15a   :  { %v767_v42 = vpop.eup %766  ;;  %v335_v43 = vadd.f32 %v325_v24, %v243_v41  ;;  %v353_v44 = vmul.f32 %v765_v39, %v665_v37 }
 0x15b   :  { %776 = vtanh.f32 %v336_v40  ;;  %v352_v46 = vmul.f32 %v767_v42, %v665_v37 }
 0x15c   :  { %778 = vtanh.f32 %v335_v43  ;;  %v363_v45 = vsel %vm122_vm1, %v353_v44, 0.0 }
 0x15d   :  { %v769_v47 = vpop.eup %768  ;;  %364 = vadd.xlane.f32.xlu0 %v363_v45  ;;  %v360_v50 = vsel %vm122_vm1, %v352_v46, 0.0 }
 0x15e   :  { %v771_v48 = vpop.eup %770  ;;  %v355_v49 = vmul.f32 %v769_v47, %v665_v37 }
 0x15f   :  { %v354_v52 = vmul.f32 %v771_v48, %v665_v37 }
 0x160   :  { %v369_v51 = vsel %vm122_vm1, %v355_v49, 0.0 }
 0x161   :  { %v773_v53 = vpop.eup %772  ;;  %361 = vadd.xlane.f32.xlu0 %v360_v50  ;;  %370 = vadd.xlane.f32.xlu1 %v369_v51  ;;  %v366_v56 = vsel %vm122_vm1, %v354_v52, 0.0 }
 0x162   :  { %v775_v54 = vpop.eup %774  ;;  %v357_v57 = vmul.f32 %v773_v53, %v665_v37 }
 0x163   :  { %v356_v55 = vmul.f32 %v775_v54, %v665_v37 }
 0x164   :  { %v375_v62 = vsel %vm122_vm1, %v357_v57, 0.0 }
 0x165   :  { %v777_v58 = vpop.eup %776  ;;  %367 = vadd.xlane.f32.xlu1 %v366_v56  ;;  %v372_v59 = vsel %vm122_vm1, %v356_v55, 0.0 }
 0x166   :  { %v779_v60 = vpop.eup %778  ;;  %373 = vadd.xlane.f32.xlu0 %v372_v59  ;;  %v359_v63 = vmul.f32 %v777_v58, %v665_v37 }
 0x167   :  { %v358_v61 = vmul.f32 %v779_v60, %v665_v37 }
 0x168   :  { %v381_v2 = vsel %vm122_vm1, %v359_v63, 0.0 }
 0x169   :  { %376 = vadd.xlane.f32.xlu1 %v375_v62  ;;  %v378_v1 = vsel %vm122_vm1, %v358_v61, 0.0  ;;  %v475_v61 = vsub.s32 1, %v1163_v5  ;;  %v468_v62 = vsub.s32 0, %v1163_v5 }
 0x16a   :  { %379 = vadd.xlane.f32.xlu0 %v378_v1 }
 0x16d   :  { %382 = vadd.xlane.f32.xlu1 %v381_v2 }
 0x1ea   :  { %v365_v6 = vpop.xlane.xlu0 %364 }
 0x1eb   :  { %v402_v11 = vrot.slane %v365_v6, %v397_v7  ;;  %v545_v6 = vld [vmem:[#allocation11] sm:$0xff] }
 0x1ee   :  { %v362_v8 = vpop.xlane.xlu0 %361  ;;  %v371_v9 = vpop.xlane.xlu1 %370 }
 0x1ef   :  { %v398_v10 = vrot.slane %v362_v8, %v397_v7  ;;  %v410_v24 = vrot.slane %v371_v9, %v397_v7 }
 0x1f1   :  { %v428_v23 = vsel %vm427_vm2, %v402_v11, %v398_v10  ;;  %v489_v11 = vsub.s32 3, %v1163_v5 }
 0x1f2   :  { %v368_v12 = vpop.xlane.xlu1 %367 }
 0x1f3   :  { %v406_v14 = vrot.slane %v368_v12, %v397_v7  ;;  %v374_v16 = vpop.xlane.xlu0 %373  ;;  %v510_v12 = vsub.s32 6, %v1163_v5 }
 0x1f4   :  { %v414_v25 = vrot.slane %v374_v16, %v397_v7  ;;  %v548_v16 = vld [vmem:[#allocation11 + $0x18] sm:$0xff] }
 0x1f5   :  { %v430_v26 = vsel %vm429_vm3, %v406_v14, %v428_v23  ;;  %v547_v14 = vld [vmem:[#allocation11 + $0x10] sm:$0xff] }
 0x1f6   :  { %v432_v27 = vsel %vm431_vm4, %v410_v24, %v430_v26  ;;  %v377_v28 = vpop.xlane.xlu1 %376  ;;  %v749_v23 = vpack.c.bf16 %v548_v16, %v547_v14  ;;  %v503_v26 = vsub.s32 5, %v1163_v5 }
 0x1f7   :  { %v434_v29 = vsel %vm433_vm5, %v414_v25, %v432_v27  ;;  %v418_v30 = vrot.slane %v377_v28, %v397_v7  ;;  %v380_v31 = vpop.xlane.xlu0 %379  ;;  %v517_v28 = vsub.s32 7, %v1163_v5 }
 0x1f8   :  { %v422_v32 = vrot.slane %v380_v31, %v397_v7 }
 0x1f9   :  { %v436_v34 = vsel %vm435_vm6, %v418_v30, %v434_v29 }
 0x1fa   :  { %v383_v35 = vpop.xlane.xlu1 %382  ;;  %v438_v37 = vsel %vm437_vm7, %v422_v32, %v436_v34 }
 0x1fb   :  { %v426_v36 = vrot.slane %v383_v35, %v397_v7  ;;  %v546_v7 = vld [vmem:[#allocation11 + $0x8] sm:$0xff] }
 0x1fc   :  { %v746_v8 = vpack.c.bf16 %v546_v7, %v545_v6 }
 0x1fd   :  { %v440_v38 = vsel %vm439_vm8, %v426_v36, %v438_v37 }
 0x1fe   :  { %v442_v39 = vsel %vm384_vm9, %v440_v38, -1e+08  ;;  %747 = vmatpush3.bf16.msra.mxu1 %v746_v8 }
 0x1ff   :  { %v444_v40 = vsel %vm443_vm10, %v442_v39, -inf  ;;  %748 = vmatprep.subr.bf16.mxu1 %v980_v0 }
 0x200   :  { %v445_v41 = vrot.slane %v444_v40, 4 }
 0x202   :  { %v446_v42 = vmax.f32 %v444_v40, %v445_v41  ;;  %750 = vmatpush3.bf16.msra.mxu1 %v749_v23 }
 0x204   :  { %v447_v43 = vrot.slane %v446_v42, 2 }
 0x206   :  { %v448_v44 = vmax.f32 %v446_v42, %v447_v43 }
 0x208   :  { %v449_v45 = vrot.slane %v448_v44, 1 }
 0x20a   :  { %v450_v46 = vmax.f32 %v448_v44, %v449_v45 }
 0x20c   :  { %v451_v47 = vsub.f32 %v442_v39, %v450_v46 }
 0x20e   :  { %v452_v48 = vmul.f32 1.442695, %v451_v47 }
 0x210   :  { %780 = vpow2.f32 %v452_v48 }
 0x21a   :  { %v781_v49 = vpop.eup %780 }
 0x21b   :  { %v454_v50 = vsel %vm443_vm10, %v781_v49, 0.0 }
 0x21c   :  { %v455_v51 = vrot.slane %v454_v50, 4 }
 0x21e   :  { %v456_v52 = vadd.f32 %v455_v51, %v454_v50 }
 0x220   :  { %v457_v53 = vrot.slane %v456_v52, 2 }
 0x222   :  { %v458_v54 = vadd.f32 %v457_v53, %v456_v52 }
 0x224   :  { %v459_v55 = vrot.slane %v458_v54, 1 }
 0x226   :  { %v460_v56 = vadd.f32 %v459_v55, %v458_v54 }
 0x228   :  { %782 = vrcp.f32 %v460_v56 }
 0x232   :  { %v783_v57 = vpop.eup %782 }
 0x233   :  { %v462_v58 = vmul.f32 %v783_v57, %v460_v56 }
 0x235   :  { %v463_v59 = vsub.f32 2.0, %v462_v58 }
 0x237   :  { %v464_v60 = vmul.f32 %v783_v57, %v463_v59 }
 0x239   :  { %v465_v63 = vmul.f32 %v781_v49, %v464_v60 }
 0x23b   :  { %622 = vst.msk [vmem:[#allocation13] sm:$0xff] %vm443_vm10, %v465_v63  ;;  %v476_v1 = vrot.slane %v465_v63, %v475_v61  ;;  %v469_v2 = vrot.slane %v465_v63, %v468_v62  ;;  %v483_v9 = vrot.slane %v465_v63, %v482_v3  ;;  %v497_v10 = vrot.slane %v465_v63, %v496_v4 }
 0x23c   :  { %v490_v24 = vrot.slane %v465_v63, %v489_v11  ;;  %v511_v25 = vrot.slane %v465_v63, %v510_v12  ;;  %v504_v27 = vrot.slane %v465_v63, %v503_v26  ;;  %v518_v29 = vrot.slane %v465_v63, %v517_v28 }
 0x23d   :  { %478 = vbcast.lane.b32.xlu1 %v476_v1, 256  ;;  %471 = vbcast.lane.b32.xlu0 %v469_v2, 256 }
 0x241   :  { %485 = vbcast.lane.b32.xlu1 %v483_v9, 256  ;;  %499 = vbcast.lane.b32.xlu0 %v497_v10, 256 }
 0x245   :  { %492 = vbcast.lane.b32.xlu1 %v490_v24, 256  ;;  %513 = vbcast.lane.b32.xlu0 %v511_v25, 256 }
 0x249   :  { %506 = vbcast.lane.b32.xlu1 %v504_v27, 256 }
 0x24d   :  { %520 = vbcast.lane.b32.xlu1 %v518_v29, 256 }
 0x2af   :  { %v479_v30 = vpop.permute.xlu1 %478  ;;  %v472_v0 = vpop.permute.xlu0 %471 }
 0x2b0   :  { %v523_v31 = vmul.f32 %v479_v30, %v1121_v15  ;;  %v522_v32 = vmul.f32 %v472_v0, %v1116_v13 }
 0x2b2   :  { %v531_v35 = vsel %vm122_vm1, %v523_v31, 0.0  ;;  %v530_v36 = vsel %vm122_vm1, %v522_v32, 0.0 }
 0x2b3   :  { %v486_v33 = vpop.permute.xlu1 %485  ;;  %v500_v34 = vpop.permute.xlu0 %499  ;;  %v532_v5 = vadd.f32 %v531_v35, %v530_v36 }
 0x2b4   :  { %v524_v37 = vmul.f32 %v486_v33, %v1123_v17  ;;  %v526_v40 = vmul.f32 %v500_v34, %v1134_v19 }
 0x2b6   :  { %v533_v38 = vsel %vm122_vm1, %v524_v37, 0.0  ;;  %v537_v45 = vsel %vm122_vm1, %v526_v40, 0.0 }
 0x2b7   :  { %v493_v39 = vpop.permute.xlu1 %492  ;;  %v534_v42 = vadd.f32 %v533_v38, %v532_v5  ;;  %v514_v15 = vpop.permute.xlu0 %513 }
 0x2b8   :  { %v525_v41 = vmul.f32 %v493_v39, %v1131_v18  ;;  %v528_v46 = vmul.f32 %v514_v15, %v1142_v21 }
 0x2ba   :  { %v535_v13 = vsel %vm122_vm1, %v525_v41, 0.0  ;;  %v541_v19 = vsel %vm122_vm1, %v528_v46, 0.0 }
 0x2bb   :  { %v536_v43 = vadd.f32 %v535_v13, %v534_v42  ;;  %v507_v44 = vpop.permute.xlu1 %506 }
 0x2bc   :  { %v527_v17 = vmul.f32 %v507_v44, %v1140_v20 }
 0x2bd   :  { %v538_v47 = vadd.f32 %v537_v45, %v536_v43 }
 0x2be   :  { %v539_v48 = vsel %vm122_vm1, %v527_v17, 0.0 }
 0x2bf   :  { %v540_v49 = vadd.f32 %v539_v48, %v538_v47  ;;  %v521_v50 = vpop.permute.xlu1 %520 }
 0x2c0   :  { %v529_v18 = vmul.f32 %v521_v50, %v1148_v22 }
 0x2c1   :  { %v542_v51 = vadd.f32 %v541_v19, %v540_v49 }
 0x2c2   :  { %v543_v52 = vsel %vm122_vm1, %v529_v18, 0.0 }
 0x2c3   :  { %v544_v53 = vadd.f32 %v543_v52, %v542_v51 }
 0x2c5   :  { %729 = vmatmul.mubr.msk.f32.vlgmr.msra.gmra.mrb[2].mxu1 %vm122_vm1, %v544_v53 }
 0x2c6   :  { %927 = shalt.err (!%p924_p10)
}
 0x2c7   :  { %s928_s11 = scalar_lea.hbm %s1227_s7, 128 }
 0x2c8   :  { %p929_p11 = scmp.ne.s32.totalorder %s1227_s7, %s928_s11  ;;  %p932_p12 = scmp.lt.u32.totalorder %s928_s11, %s1227_s7 }
 0x2ca   :  { %p934_p13 = pnand %p932_p12, %p929_p11 }
 0x2cc   :  { %937 = shalt.err (!%p934_p13)
}
 0x2cd   :  { %633 = dma.vmem_to_hbm [thread:$0]  %s631_s29, 128, %s1227_s7, [#allocation4]  }
 0x2ce   :  { %s984_s3 = smov [#allocation14]  }
 0x2cf   :  { %s640_s2 = sshll.u32 %s984_s3, 4  ;;  %s641_s2 = int_to_ptr.vmem [resolvable:$true] %s640_s2 }
 0x2d0   :  { %s938_s18 = scalar_lea.vmem %s641_s2, 128  ;;  %p943_p1 = scmp.lt.s32.totalorder %s641_s2, %s641_s2 }
 0x2d1   :  { %p939_p0 = scmp.ne.s32.totalorder %s641_s2, %s938_s18  ;;  %p944_p2 = scmp.lt.s32.totalorder %s938_s18, %s938_s18 }
 0x2d3   :  { %p945_p3 = por %p944_p2, %p943_p1 }
 0x2d5   :  { %p946_p4 = pnand %p945_p3, %p939_p0 }
 0x398   :  { %v618_v20 = vpop.f32.mrb[2].mxu1 }
 0x399   :  { %623 = vst.msk [vmem:[#allocation14] sm:$0xff] %vm122_vm1, %v618_v20  ;;  %v730_v21 = vpop.f32.mrb[3].mxu1 }
 0x39a   :  { %949 = shalt.err (!%p946_p4)
}
 0x39b   :  { %s950_s22 = scalar_lea.hbm %s1228_s8, 128 }
 0x39c   :  { %p951_p5 = scmp.ne.s32.totalorder %s1228_s8, %s950_s22  ;;  %p954_p6 = scmp.lt.u32.totalorder %s950_s22, %s1228_s8 }
 0x39e   :  { %p956_p7 = pnand %p954_p6, %p951_p5 }
 0x3a0   :  { %959 = shalt.err (!%p956_p7)
}
 0x3a1   :  { %643 = dma.vmem_to_hbm [thread:$0]  %s641_s2, 128, %s1228_s8, [#allocation15]  }
 0x3a2   :  { %968 = dma.done.wait [#allocation4], 128  }
 0x3a3   :  { %969 = vsyncadd [#allocation4], 4294967168 }
 0x3a4   :  { %970 = dma.done.wait [#allocation15], 128  }
 0x3a5   :  { %971 = vsyncadd [#allocation15], 4294967168 }
 0x3a6   :  { %650 = vsyncpa [#allocation3], 1 }
 0x3a7   :  { %651 = vsyncpa [#allocation6], 1 }
 0x3a8   :  { %652 = vsyncpa [#allocation9], 1 }
 0x3a9   :  { %653 = vsyncpa [#allocation12], 1 }
 0x3aa   :  { %654 = vsyncpa [#allocation4], 1 }
 0x3ab   :  { %655 = vsyncpa [#allocation15], 1 }

</bundles_post_ra>
